<compile_context>
chip_gen: v7x
topology: tpu7x:2x2x1
jax: 0.10.0
libtpu: 0.0.40
codegen_flags: <defaults>
</compile_context>

<pallas_src>
import functools
import math

import jax
import jax.numpy as jnp
from jax.experimental import pallas as pl
from jax.experimental.pallas import tpu as pltpu

_LANES = 128
_MIB = 1024 * 1024
_MAX_PACK_WIDTH = 512        # cap on lcm(D, 128) for the packed path


def _cdiv(a, b):
    return (a + b - 1) // b


def _round_up(n, m):
    return _cdiv(n, m) * m


# ---------------------------------------------------------------------------
# Kernels
# ---------------------------------------------------------------------------

def _presbn_row_kernel(x_ref, o_ref, *, eps, d):
    """Generic path: one logical row per tile row; full D resident on lanes."""
    x = x_ref[...].astype(jnp.float32)
    inv_d = 1.0 / d
    mean = jnp.sum(x, axis=-1, keepdims=True) * inv_d
    xc = x - mean
    sumsq = jnp.sum(xc * xc, axis=-1, keepdims=True)       # = D * var
    inv_std = jax.lax.rsqrt(sumsq * inv_d + eps)
    # ||xn||^2 = sum(xc^2) * inv_std^2 ; fuse both per-row scales into one mul.
    scale = inv_std * jax.lax.rsqrt(sumsq * inv_std * inv_std)
    o_ref[...] = (xc * scale).astype(o_ref.dtype)


def _split_hi_lo(v):
    """Split an f32 array into bf16 hi/lo parts with v ~= hi + lo (~17 bits)."""
    hi = v.astype(jnp.bfloat16)
    lo = (v - hi.astype(jnp.float32)).astype(jnp.bfloat16)
    return hi, lo


def _segment_sum(v, seg_bf16):
    """Per-segment sum (broadcast back across each segment) on the MXU.

    seg_bf16 is an exactly-representable 0/1 block-diagonal matrix, so the
    only rounding comes from the 2-term bf16 split of `v`: two native bf16
    MXU passes per reduction instead of the 6-pass HIGHEST f32 emulation.
    """
    hi, lo = _split_hi_lo(v)
    return (jnp.dot(hi, seg_bf16, preferred_element_type=jnp.float32)
            + jnp.dot(lo, seg_bf16, preferred_element_type=jnp.float32))


def _presbn_packed_kernel(seg_ref, x_ref, o_ref, *, eps, d):
    """Lane-dense path: width // d logical rows packed per lane-dense row.

    Segment mean / variance are computed (and broadcast back across each
    D-segment) with the resident block-diagonal matrix on the otherwise idle
    MXU; everything else is full-tile elementwise VPU/EUP work, so loads and
    stores stay unmasked and lane-dense.
    """
    x = x_ref[...].astype(jnp.float32)
    seg = seg_ref[...]                                      # (width, width) bf16
    inv_d = 1.0 / d
    sum_x = _segment_sum(x, seg)
    xc = x - sum_x * inv_d
    sumsq = _segment_sum(xc * xc, seg)                      # = D * var per lane
    inv_std = jax.lax.rsqrt(sumsq * inv_d + eps)
    scale = inv_std * jax.lax.rsqrt(sumsq * inv_std * inv_std)
    o_ref[...] = (xc * scale).astype(o_ref.dtype)


# ---------------------------------------------------------------------------
# Generation-aware sizing
# ---------------------------------------------------------------------------

def _tpu_vmem_capacity_bytes():
    try:
        return int(pltpu.get_tpu_info().vmem_capacity_bytes)
    except Exception:
        return 64 * _MIB             # conservative (v7x-sized) default


def _num_tensorcores_per_chip():
    try:
        kind = jax.devices()[0].device_kind.lower()
    except Exception:
        return 1
    return 2 if ("v7" in kind or "v4" in kind or "v5p" in kind) else 1


def _vmem_plan():
    """(vmem_limit_bytes, per-tile working-set budget) per TPU generation."""
    cap = _tpu_vmem_capacity_bytes()
    if cap >= 96 * _MIB:             # v5e / v6e: 128 MiB physical VMEM
        return 100 * _MIB, 80 * _MIB
    # v7x-like: 64 MiB physical per TensorCore -> stay well below it.
    return 56 * _MIB, 44 * _MIB


def _sublane_packing(itemsize):
    return {1: 32, 2: 16, 4: 8}.get(int(itemsize), 8)


def _pick_tile_rows(rows, width, itemsize, working_budget, cores):
    """Largest sublane-aligned row tile whose working set (2 pipeline copies
    of in+out plus ~3 tile-sized f32 temporaries) fits the VMEM budget."""
    sub = _sublane_packing(itemsize)
    bytes_per_row = width * (4 * int(itemsize) + 3 * 4)
    tr = max(sub, working_budget // bytes_per_row)
    tr = min(tr, _round_up(rows, sub))
    tr = max(sub, (tr // sub) * sub)
    if cores >= 2 and rows > cores * sub:
        # Multi-TensorCore chip: make the ("parallel",) row grid splittable
        # across cores with a balanced (multiple-of-cores) step count.
        steps = _cdiv(rows, tr)
        if steps % cores != 0:
            steps = _round_up(steps, cores)
            tr = max(sub, _round_up(_cdiv(rows, steps), sub))
    return tr


# ---------------------------------------------------------------------------
# pallas_call wrappers
# ---------------------------------------------------------------------------

def _presbn_rows_call(x2, eps, vmem_limit, budget, cores):
    rows, d = x2.shape
    itemsize = jnp.dtype(x2.dtype).itemsize
    tr = _pick_tile_rows(rows, d, itemsize, budget, cores)
    kernel = functools.partial(_presbn_row_kernel, eps=float(eps), d=d)
    return pl.pallas_call(
        kernel,
        out_shape=jax.ShapeDtypeStruct((rows, d), x2.dtype),
        grid_spec=pltpu.PrefetchScalarGridSpec(
            num_scalar_prefetch=0,
            grid=(_cdiv(rows, tr),),
            in_specs=[pl.BlockSpec((tr, d), lambda i: (i, 0))],
            out_specs=pl.BlockSpec((tr, d), lambda i: (i, 0)),
        ),
        compiler_params=pltpu.CompilerParams(
            dimension_semantics=("parallel",),
            vmem_limit_bytes=vmem_limit,
        ),
    )(x2)


def _presbn_packed_call(x2, d, eps, vmem_limit, budget, cores):
    rows, width = x2.shape
    itemsize = jnp.dtype(x2.dtype).itemsize
    # Block-diagonal 0/1 segment matrix (exactly representable in bf16).
    # Passed as an input with a constant index_map so it is DMA'd once and
    # stays resident in VMEM instead of being rebuilt every grid step.
    seg_idx = jnp.arange(width, dtype=jnp.int32) // d
    seg = (seg_idx[:, None] == seg_idx[None, :]).astype(jnp.bfloat16)
    seg_bytes = width * width * 2
    tr = _pick_tile_rows(rows, width, itemsize, budget - seg_bytes, cores)
    kernel = functools.partial(_presbn_packed_kernel, eps=float(eps), d=d)
    return pl.pallas_call(
        kernel,
        out_shape=jax.ShapeDtypeStruct((rows, width), x2.dtype),
        grid_spec=pltpu.PrefetchScalarGridSpec(
            num_scalar_prefetch=0,
            grid=(_cdiv(rows, tr),),
            in_specs=[
                pl.BlockSpec((width, width), lambda i: (0, 0)),   # resident
                pl.BlockSpec((tr, width), lambda i: (i, 0)),
            ],
            out_specs=pl.BlockSpec((tr, width), lambda i: (i, 0)),
        ),
        compiler_params=pltpu.CompilerParams(
            dimension_semantics=("parallel",),
            vmem_limit_bytes=vmem_limit,
        ),
    )(seg, x2)


def _packing_factor(d):
    if d >= _LANES:
        return 1
    width = d * (_LANES // math.gcd(d, _LANES))             # lcm(d, 128)
    if width > _MAX_PACK_WIDTH:
        return 1
    return width // d


def presbn(x, eps=1e-12):
    """Pallas implementation of PreSBN.forward.  Works for any rank >= 1."""
    orig_shape = x.shape
    d = int(orig_shape[-1])
    rows = 1
    for s in orig_shape[:-1]:
        rows *= int(s)
    x_flat = x.reshape(rows, d)

    vmem_limit, budget = _vmem_plan()
    cores = _num_tensorcores_per_chip()
    k = _packing_factor(d)

    pieces = []
    rows_main = (rows // k) * k if k > 1 else 0
    if rows_main > 0:
        # Lane-dense packed path: k logical rows per lane-dense row (the
        # reshape is free for the common rows % k == 0 case).
        x_main = x_flat[:rows_main].reshape(rows_main // k, k * d)
        out_main = _presbn_packed_call(x_main, d, eps, vmem_limit, budget, cores)
        pieces.append(out_main.reshape(rows_main, d))
    if rows - rows_main > 0:
        # Remainder rows (< k of them) or the generic D >= 128 path.
        out_rest = _presbn_rows_call(x_flat[rows_main:], eps, vmem_limit,
                                     budget, cores)
        pieces.append(out_rest)
    out_flat = pieces[0] if len(pieces) == 1 else jnp.concatenate(pieces, axis=0)
    return out_flat.reshape(orig_shape)


def presbn_ref(x, eps=1e-12):
    """Pure-JAX reference mirroring the PyTorch module."""
    x = x.astype(jnp.float32)
    x = x - jnp.mean(x, axis=-1, keepdims=True)
    var = jnp.mean(x * x, axis=-1, keepdims=True)            # unbiased=False
    x = x / jnp.sqrt(var + eps)
    return x / jnp.sqrt(jnp.sum(x * x, axis=-1, keepdims=True))


if __name__ == "__main__":
    key = jax.random.PRNGKey(0)
    # NCHW-style input; last axis (W=16) exercises the lane-dense packed path.
    x = jax.random.normal(key, (2, 4, 16, 16), dtype=jnp.float32)
    out = jax.block_until_ready(presbn(x))
    assert out.shape == x.shape and out.dtype == x.dtype
    err = jnp.max(jnp.abs(out.astype(jnp.float32) - presbn_ref(x)))
    if not bool(err < 1e-4):
        raise AssertionError(f"packed path mismatch vs reference: max abs err {err}")

    # Generic (non-packed) row kernel path (D >= 128).
    x2 = jax.random.normal(jax.random.PRNGKey(1), (2, 8, 256), dtype=jnp.float32)
    out2 = jax.block_until_ready(presbn(x2))
    err2 = jnp.max(jnp.abs(out2.astype(jnp.float32) - presbn_ref(x2)))
    if not bool(err2 < 1e-5):
        raise AssertionError(f"row path mismatch vs reference: max abs err {err2}")

    # Packed path where the row count does not divide k: remainder handled by
    # a second tiny pallas_call instead of padding the whole array.
    x3 = jax.random.normal(jax.random.PRNGKey(2), (3, 5, 16), dtype=jnp.float32)
    out3 = jax.block_until_ready(presbn(x3))
    err3 = jnp.max(jnp.abs(out3.astype(jnp.float32) - presbn_ref(x3)))
    if not bool(err3 < 1e-4):
        raise AssertionError(f"remainder path mismatch vs reference: max abs err {err3}")

    print("KERNEL_OK")
</pallas_src>

<mosaic_0001>
module attributes {stable_mosaic.version = 11 : i64} {
  func.func @_presbn_packed_kernel(%arg0: i32, %arg1: memref<128x128xbf16, #tpu.memory_space<vmem>>, %arg2: memref<16x128xf32, #tpu.memory_space<vmem>>, %arg3: memref<16x128xf32, #tpu.memory_space<vmem>>) attributes {dimension_semantics = [#tpu.dimension_semantics<parallel>], iteration_bounds = array<i64: 1>, scalar_prefetch = 0 : i64, scratch_operands = 0 : i64, tpu.core_type = #tpu.core_type<tc>, window_params = [{pipeline_mode = #tpu.pipeline_mode<synchronous>, transform_indices = @transform_0, window_bounds = array<i64: 128, 128>}, {transform_indices = @transform_1, window_bounds = array<i64: 16, 128>}, {transform_indices = @transform_2, window_bounds = array<i64: 16, 128>}]} {
    %c0 = arith.constant 0 : index
    %c0_0 = arith.constant 0 : index
    %0 = vector.load %arg2[%c0, %c0_0] : memref<16x128xf32, #tpu.memory_space<vmem>>, vector<16x128xf32>
    %c0_1 = arith.constant 0 : index
    %c0_2 = arith.constant 0 : index
    %1 = vector.load %arg1[%c0_1, %c0_2] : memref<128x128xbf16, #tpu.memory_space<vmem>>, vector<128x128xbf16>
    %2 = arith.truncf %0 : vector<16x128xf32> to vector<16x128xbf16>
    %3 = arith.extf %2 : vector<16x128xbf16> to vector<16x128xf32>
    %4 = arith.subf %0, %3 : vector<16x128xf32>
    %5 = arith.truncf %4 : vector<16x128xf32> to vector<16x128xbf16>
    %cst = arith.constant dense<0.000000e+00> : vector<16x128xf32>
    %6 = tpu.matmul %2, %1, %cst {dimension_numbers = #tpu.dot_dimension_numbers<[1], [0], [0], [1], [0, 0, 1, 1], [], []>} : vector<16x128xbf16>, vector<128x128xbf16>, vector<16x128xf32> -> vector<16x128xf32>
    %cst_3 = arith.constant dense<0.000000e+00> : vector<16x128xf32>
    %7 = tpu.matmul %5, %1, %cst_3 {dimension_numbers = #tpu.dot_dimension_numbers<[1], [0], [0], [1], [0, 0, 1, 1], [], []>} : vector<16x128xbf16>, vector<128x128xbf16>, vector<16x128xf32> -> vector<16x128xf32>
    %8 = arith.addf %6, %7 : vector<16x128xf32>
    %cst_4 = arith.constant 6.250000e-02 : f32
    %9 = vector.broadcast %cst_4 : f32 to vector<16x128xf32>
    %10 = arith.mulf %8, %9 : vector<16x128xf32>
    %11 = arith.subf %0, %10 : vector<16x128xf32>
    %12 = arith.mulf %11, %11 : vector<16x128xf32>
    %13 = arith.truncf %12 : vector<16x128xf32> to vector<16x128xbf16>
    %14 = arith.extf %13 : vector<16x128xbf16> to vector<16x128xf32>
    %15 = arith.subf %12, %14 : vector<16x128xf32>
    %16 = arith.truncf %15 : vector<16x128xf32> to vector<16x128xbf16>
    %cst_5 = arith.constant dense<0.000000e+00> : vector<16x128xf32>
    %17 = tpu.matmul %13, %1, %cst_5 {dimension_numbers = #tpu.dot_dimension_numbers<[1], [0], [0], [1], [0, 0, 1, 1], [], []>} : vector<16x128xbf16>, vector<128x128xbf16>, vector<16x128xf32> -> vector<16x128xf32>
    %cst_6 = arith.constant dense<0.000000e+00> : vector<16x128xf32>
    %18 = tpu.matmul %16, %1, %cst_6 {dimension_numbers = #tpu.dot_dimension_numbers<[1], [0], [0], [1], [0, 0, 1, 1], [], []>} : vector<16x128xbf16>, vector<128x128xbf16>, vector<16x128xf32> -> vector<16x128xf32>
    %19 = arith.addf %17, %18 : vector<16x128xf32>
    %cst_7 = arith.constant 6.250000e-02 : f32
    %20 = vector.broadcast %cst_7 : f32 to vector<16x128xf32>
    %21 = arith.mulf %19, %20 : vector<16x128xf32>
    %cst_8 = arith.constant 9.99999996E-13 : f32
    %22 = vector.broadcast %cst_8 : f32 to vector<16x128xf32>
    %23 = arith.addf %21, %22 : vector<16x128xf32>
    %24 = math.rsqrt %23 : vector<16x128xf32>
    %25 = arith.mulf %19, %24 : vector<16x128xf32>
    %26 = arith.mulf %25, %24 : vector<16x128xf32>
    %27 = math.rsqrt %26 : vector<16x128xf32>
    %28 = arith.mulf %24, %27 : vector<16x128xf32>
    %29 = arith.mulf %11, %28 : vector<16x128xf32>
    %c0_9 = arith.constant 0 : index
    %c0_10 = arith.constant 0 : index
    %30 = vector.load %arg3[%c0_9, %c0_10] : memref<16x128xf32, #tpu.memory_space<vmem>>, vector<16x128xf32>
    tpu.vector_store %arg3[%c0_9, %c0_10], %29 {strides = array<i32>} : memref<16x128xf32, #tpu.memory_space<vmem>>, vector<16x128xf32>,
    return
  }
  func.func @transform_0(%arg0: i32) -> (i32, i32) {
    %c0_i32 = arith.constant 0 : i32
    %c0_i32_0 = arith.constant 0 : i32
    %c0_i32_1 = arith.constant 0 : i32
    return %c0_i32, %c0_i32_0 : i32, i32
  }
  func.func @transform_1(%arg0: i32) -> (i32, i32) {
    %c0_i32 = arith.constant 0 : i32
    %c0_i32_0 = arith.constant 0 : i32
    return %arg0, %c0_i32 : i32, i32
  }
  func.func @transform_2(%arg0: i32) -> (i32, i32) {
    %c0_i32 = arith.constant 0 : i32
    %c0_i32_0 = arith.constant 0 : i32
    return %arg0, %c0_i32 : i32, i32
  }
}

</mosaic_0001>

<bundles_post_ra>
// kernel: tpu_custom_call.1
= control target key start
LH: loop header
LB: loop body
LE: loop exit
PB: predicated region body
PF: predicated region fallthrough
CT: control target
= control target key end

     0   :  { %7 = vsyncpa [#allocation3], 0  ;;  %s702_s0 = inlined_call_operand.hbm [shape: bf16[128,128], index: 0, kind: input, shape index: {}]   ;;  %s703_s1 = inlined_call_operand.hbm [shape: f32[16,128], index: 1, kind: input, shape index: {}]   ;;  %s704_s2 = inlined_call_operand.hbm [shape: f32[16,128], index: 2, kind: output, shape index: {}]  }
   0x1   :  { %8 = vsyncpa [#allocation6], 0 }
   0x2   :  { %9 = vsyncpa [#allocation4], 0  ;;  %s554_s9 = smov [#allocation2]   ;;  %s482_s13 = scalar_lea.hbm %s702_s0, 1024 }
   0x3   :  { %s15_s10 = sshll.u32 %s554_s9, 4  ;;  %p483_p0 = scmp.ne.s32.totalorder %s702_s0, %s482_s13  ;;  %s16_s10 = int_to_ptr.vmem [resolvable:$true] %s15_s10 }
   0x4   :  { %p486_p1 = scmp.lt.u32.totalorder %s482_s13, %s702_s0 }
   0x6   :  { %p488_p2 = pnand %p486_p1, %p483_p0 }
   0x8   :  { %491 = shalt.err (!%p488_p2)
}
   0x9   :  { %s492_s18 = scalar_lea.vmem %s16_s10, 1024  ;;  %p497_p4 = scmp.lt.s32.totalorder %s16_s10, %s16_s10 }
   0xa   :  { %p493_p3 = scmp.ne.s32.totalorder %s16_s10, %s492_s18  ;;  %p498_p5 = scmp.lt.s32.totalorder %s492_s18, %s492_s18 }
   0xc   :  { %p499_p6 = por %p498_p5, %p497_p4 }
   0xe   :  { %p500_p7 = pnand %p499_p6, %p493_p3 }
  0x10   :  { %503 = shalt.err (!%p500_p7)
}
  0x11   :  { %s555_s19 = smov 64   ;;  %s556_s20 = smov 4  }
  0x12   :  { %21 = dma.hbm_to_vmem [thread:$0]  %s702_s0, 1024, %s16_s10, [#allocation3], %s555_s19, %s555_s19, %s556_s20  }
  0x13   :  { %s557_s23 = smov [#allocation5]   ;;  %s504_s27 = scalar_lea.hbm %s703_s1, 256 }
  0x14   :  { %s27_s24 = sshll.u32 %s557_s23, 4  ;;  %p505_p8 = scmp.ne.s32.totalorder %s703_s1, %s504_s27  ;;  %s28_s24 = int_to_ptr.vmem [resolvable:$true] %s27_s24 }
  0x15   :  { %p508_p9 = scmp.lt.u32.totalorder %s504_s27, %s703_s1 }
  0x17   :  { %p510_p10 = pnand %p508_p9, %p505_p8 }
  0x19   :  { %513 = shalt.err (!%p510_p10)
}
  0x1a   :  { %s514_s4 = scalar_lea.vmem %s28_s24, 256  ;;  %p519_p12 = scmp.lt.s32.totalorder %s28_s24, %s28_s24 }
  0x1b   :  { %p515_p11 = scmp.ne.s32.totalorder %s28_s24, %s514_s4  ;;  %p520_p13 = scmp.lt.s32.totalorder %s514_s4, %s514_s4 }
  0x1d   :  { %p521_p0 = por %p520_p13, %p519_p12 }
  0x1f   :  { %p522_p1 = pnand %p521_p0, %p515_p11 }
  0x21   :  { %525 = shalt.err (!%p522_p1)
}
  0x22   :  { %s558_s0 = smov 128   ;;  %s559_s5 = smov 8  }
  0x23   :  { %33 = dma.hbm_to_vmem [thread:$0]  %s703_s1, 256, %s28_s24, [#allocation6], %s558_s0, %s558_s0, %s559_s5  }
  0x24   :  { %548 = dma.done.wait [#allocation3], 1024  }
  0x25   :  { %549 = vsyncadd [#allocation3], 4294966272 }
  0x26   :  { %550 = dma.done.wait [#allocation6], 256  }
  0x27   :  { %551 = vsyncadd [#allocation6], 4294967040  ;;  %v560_v0 = vmov 0.0   ;;  %vm561_vm0 = vmmov 0   ;;  %v611_v1 = vld [vmem:[#allocation2] sm:$0xff]   ;;  %v614_v2 = vld [vmem:[#allocation2 + $0x8] sm:$0xff]  }
  0x28   :  { %369 = vmatprep.subr.bf16.mxu0 %v560_v0  ;;  %385 = vmatprep.mubr.msk.bf16.mxu0 %vm561_vm0, %v560_v0  ;;  %v620_v3 = vld [vmem:[#allocation2 + $0x10] sm:$0xff]   ;;  %v626_v4 = vld [vmem:[#allocation2 + $0x18] sm:$0xff]   ;;  %v632_v5 = vld [vmem:[#allocation2 + $0x20] sm:$0xff]   ;;  %s562_s1 = smov [#allocation7]  }
  0x29   :  { %409 = vmatprep.subr.bf16.mxu1 %v560_v0  ;;  %425 = vmatprep.mubr.msk.bf16.mxu1 %vm561_vm0, %v560_v0  ;;  %v41_v6 = vld [vmem:[#allocation5] sm:$0xff]  ;;  %v42_v7 = vld [vmem:[#allocation5 + $0x8] sm:$0xff]  ;;  %v644_v12 = vld [vmem:[#allocation2 + $0x30] sm:$0xff]   ;;  %s312_s8 = sshll.u32 %s562_s1, 4  ;;  %s313_s8 = int_to_ptr.vmem [resolvable:$true] %s312_s8 }
  0x2a   :  { %370 = vmatpush3.bf16.msra.mxu0 %v611_v1  ;;  %410 = vmatpush3.bf16.msra.mxu1 %v611_v1  ;;  %v59_v8 = vpack.c.bf16 %v42_v7, %v41_v6  ;;  %v638_v9 = vld [vmem:[#allocation2 + $0x28] sm:$0xff]   ;;  %v473_v15 = vld [vmem:[#allocation2 + $0x38] sm:$0xff]   ;;  %s526_s9 = scalar_lea.vmem %s313_s8, 256  ;;  %p531_p3 = scmp.lt.s32.totalorder %s313_s8, %s313_s8 }
  0x2b   :  { %371 = vmatprep.subr.bf16.mxu0 %v560_v0  ;;  %411 = vmatprep.subr.bf16.mxu1 %v560_v0  ;;  %p527_p2 = scmp.ne.s32.totalorder %s313_s8, %s526_s9  ;;  %p532_p4 = scmp.lt.s32.totalorder %s526_s9, %s526_s9 }
  0x2c   :  { %v60_v10 = vunpack.c.l.bf16 %v59_v8  ;;  %v61_v11 = vunpack.c.h.bf16 %v59_v8 }
  0x2d   :  { %p533_p5 = por %p532_p4, %p531_p3 }
  0x2e   :  { %372 = vmatpush3.bf16.msra.mxu0 %v614_v2  ;;  %412 = vmatpush3.bf16.msra.mxu1 %v614_v2  ;;  %v62_v13 = vsub.f32 %v41_v6, %v60_v10  ;;  %v63_v14 = vsub.f32 %v42_v7, %v61_v11 }
  0x2f   :  { %373 = vmatprep.subr.bf16.mxu0 %v560_v0  ;;  %413 = vmatprep.subr.bf16.mxu1 %v560_v0  ;;  %p534_p6 = pnand %p533_p5, %p527_p2 }
  0x30   :  { %v64_v16 = vpack.c.bf16 %v63_v14, %v62_v13 }
  0x32   :  { %374 = vmatpush3.bf16.msra.mxu0 %v620_v3  ;;  %414 = vmatpush3.bf16.msra.mxu1 %v620_v3 }
  0x33   :  { %375 = vmatprep.subr.bf16.mxu0 %v560_v0  ;;  %415 = vmatprep.subr.bf16.mxu1 %v560_v0 }
  0x36   :  { %376 = vmatpush3.bf16.msra.mxu0 %v626_v4  ;;  %416 = vmatpush3.bf16.msra.mxu1 %v626_v4 }
  0x37   :  { %377 = vmatprep.subr.bf16.mxu0 %v560_v0  ;;  %417 = vmatprep.subr.bf16.mxu1 %v560_v0 }
  0x3a   :  { %378 = vmatpush3.bf16.msra.mxu0 %v632_v5  ;;  %418 = vmatpush3.bf16.msra.mxu1 %v632_v5 }
  0x3b   :  { %379 = vmatprep.subr.bf16.mxu0 %v560_v0  ;;  %419 = vmatprep.subr.bf16.mxu1 %v560_v0 }
  0x3e   :  { %380 = vmatpush3.bf16.msra.mxu0 %v638_v9  ;;  %420 = vmatpush3.bf16.msra.mxu1 %v638_v9 }
  0x3f   :  { %381 = vmatprep.subr.bf16.mxu0 %v560_v0  ;;  %421 = vmatprep.subr.bf16.mxu1 %v560_v0 }
  0x42   :  { %382 = vmatpush3.bf16.msra.mxu0 %v644_v12  ;;  %422 = vmatpush3.bf16.msra.mxu1 %v644_v12 }
  0x43   :  { %383 = vmatprep.subr.bf16.mxu0 %v560_v0  ;;  %423 = vmatprep.subr.bf16.mxu1 %v560_v0 }
  0x46   :  { %384 = vmatpush3.bf16.msra.mxu0 %v473_v15  ;;  %424 = vmatpush3.bf16.msra.mxu1 %v473_v15 }
  0x47   :  { %389 = vmatprep.subr.bf16.mxu0 %v560_v0  ;;  %429 = vmatprep.subr.bf16.mxu1 %v560_v0 }
  0x49   :  { %386 = vmatmul.mubr.bf16.vlgmr.msra.gmra.mrb[0].mxu0 %v64_v16 }
  0x4a   :  { %390 = vmatpush3.bf16.msra.mxu0 %v611_v1  ;;  %405 = vmatprep.mubr.msk.bf16.mxu0 %vm561_vm0, %v560_v0 }
  0x4b   :  { %391 = vmatprep.subr.bf16.mxu0 %v560_v0 }
  0x4e   :  { %392 = vmatpush3.bf16.msra.mxu0 %v614_v2 }
  0x4f   :  { %393 = vmatprep.subr.bf16.mxu0 %v560_v0 }
  0x52   :  { %394 = vmatpush3.bf16.msra.mxu0 %v620_v3 }
  0x53   :  { %395 = vmatprep.subr.bf16.mxu0 %v560_v0 }
  0x56   :  { %396 = vmatpush3.bf16.msra.mxu0 %v626_v4 }
  0x57   :  { %397 = vmatprep.subr.bf16.mxu0 %v560_v0 }
  0x5a   :  { %398 = vmatpush3.bf16.msra.mxu0 %v632_v5 }
  0x5b   :  { %399 = vmatprep.subr.bf16.mxu0 %v560_v0 }
  0x5e   :  { %400 = vmatpush3.bf16.msra.mxu0 %v638_v9 }
  0x5f   :  { %401 = vmatprep.subr.bf16.mxu0 %v560_v0 }
  0x62   :  { %402 = vmatpush3.bf16.msra.mxu0 %v644_v12 }
  0x63   :  { %403 = vmatprep.subr.bf16.mxu0 %v560_v0 }
  0x66   :  { %404 = vmatpush3.bf16.msra.mxu0 %v473_v15 }
  0x69   :  { %406 = vmatmul.mubr.bf16.vlgmr.msra.gmra.mrb[0].mxu0 %v59_v8 }
 0x13c   :  { %v188_v17 = vpop.f32.mrb[0].mxu0 }
 0x13d   :  { %v195_v18 = vmul.f32 0.0625, %v188_v17  ;;  %v407_v19 = vpop.f32.mrb[1].mxu0 }
 0x13e   :  { %v191_v20 = vpop.f32.mrb[2].mxu0 }
 0x13f   :  { %v197_v21 = vsub.f32 %v41_v6, %v195_v18  ;;  %v196_v22 = vmul.f32 0.0625, %v191_v20  ;;  %v408_v23 = vpop.f32.mrb[3].mxu0 }
 0x141   :  { %v198_v24 = vsub.f32 %v42_v7, %v196_v22  ;;  %v199_v25 = vmul.f32 %v197_v21, %v197_v21 }
 0x143   :  { %v200_v26 = vmul.f32 %v198_v24, %v198_v24 }
 0x145   :  { %v201_v27 = vpack.c.bf16 %v200_v26, %v199_v25 }
 0x147   :  { %v202_v28 = vunpack.c.l.bf16 %v201_v27  ;;  %v203_v29 = vunpack.c.h.bf16 %v201_v27 }
 0x149   :  { %v204_v30 = vsub.f32 %v199_v25, %v202_v28  ;;  %v205_v31 = vsub.f32 %v200_v26, %v203_v29 }
 0x14b   :  { %v206_v32 = vpack.c.bf16 %v205_v31, %v204_v30 }
 0x14d   :  { %426 = vmatmul.mubr.bf16.vlgmr.msra.gmra.mrb[0].mxu1 %v206_v32 }
 0x14e   :  { %430 = vmatpush3.bf16.msra.mxu1 %v611_v1  ;;  %445 = vmatprep.mubr.msk.bf16.mxu1 %vm561_vm0, %v560_v0 }
 0x14f   :  { %431 = vmatprep.subr.bf16.mxu1 %v560_v0 }
 0x152   :  { %432 = vmatpush3.bf16.msra.mxu1 %v614_v2 }
 0x153   :  { %433 = vmatprep.subr.bf16.mxu1 %v560_v0 }
 0x156   :  { %434 = vmatpush3.bf16.msra.mxu1 %v620_v3 }
 0x157   :  { %435 = vmatprep.subr.bf16.mxu1 %v560_v0 }
 0x15a   :  { %436 = vmatpush3.bf16.msra.mxu1 %v626_v4 }
 0x15b   :  { %437 = vmatprep.subr.bf16.mxu1 %v560_v0 }
 0x15e   :  { %438 = vmatpush3.bf16.msra.mxu1 %v632_v5 }
 0x15f   :  { %439 = vmatprep.subr.bf16.mxu1 %v560_v0 }
 0x162   :  { %440 = vmatpush3.bf16.msra.mxu1 %v638_v9 }
 0x163   :  { %441 = vmatprep.subr.bf16.mxu1 %v560_v0 }
 0x166   :  { %442 = vmatpush3.bf16.msra.mxu1 %v644_v12 }
 0x167   :  { %443 = vmatprep.subr.bf16.mxu1 %v560_v0 }
 0x16a   :  { %444 = vmatpush3.bf16.msra.mxu1 %v473_v15 }
 0x16d   :  { %446 = vmatmul.mubr.bf16.vlgmr.msra.gmra.mrb[0].mxu1 %v201_v27 }
 0x240   :  { %v282_v33 = vpop.f32.mrb[0].mxu1 }
 0x241   :  { %v289_v34 = vmul.f32 0.0625, %v282_v33  ;;  %v447_v35 = vpop.f32.mrb[1].mxu1 }
 0x242   :  { %v285_v36 = vpop.f32.mrb[2].mxu1 }
 0x243   :  { %v291_v37 = vadd.f32 1e-12, %v289_v34  ;;  %v290_v38 = vmul.f32 0.0625, %v285_v36  ;;  %v448_v39 = vpop.f32.mrb[3].mxu1 }
 0x245   :  { %474 = vrsqrt.f32 %v291_v37  ;;  %v292_v40 = vadd.f32 1e-12, %v290_v38 }
 0x247   :  { %476 = vrsqrt.f32 %v292_v40 }
 0x24f   :  { %v475_v41 = vpop.eup %474 }
 0x250   :  { %v295_v42 = vmul.f32 %v475_v41, %v282_v33 }
 0x251   :  { %v477_v43 = vpop.eup %476 }
 0x252   :  { %v297_v44 = vmul.f32 %v475_v41, %v295_v42  ;;  %v296_v45 = vmul.f32 %v477_v43, %v285_v36 }
 0x254   :  { %478 = vrsqrt.f32 %v297_v44  ;;  %v298_v46 = vmul.f32 %v477_v43, %v296_v45 }
 0x256   :  { %480 = vrsqrt.f32 %v298_v46 }
 0x25e   :  { %v479_v47 = vpop.eup %478 }
 0x25f   :  { %v301_v48 = vmul.f32 %v479_v47, %v475_v41 }
 0x260   :  { %v481_v49 = vpop.eup %480 }
 0x261   :  { %v302_v50 = vmul.f32 %v481_v49, %v477_v43  ;;  %v303_v51 = vmul.f32 %v301_v48, %v197_v21 }
 0x263   :  { %v304_v52 = vmul.f32 %v302_v50, %v198_v24  ;;  %305 = vst [vmem:[#allocation7] sm:$0xff] %v303_v51 }
 0x265   :  { %306 = vst [vmem:[#allocation7 + $0x8] sm:$0xff] %v304_v52 }
 0x266   :  { %537 = shalt.err (!%p534_p6)
}
 0x267   :  { %s538_s12 = scalar_lea.hbm %s704_s2, 256 }
 0x268   :  { %p539_p7 = scmp.ne.s32.totalorder %s704_s2, %s538_s12  ;;  %p542_p8 = scmp.lt.u32.totalorder %s538_s12, %s704_s2 }
 0x26a   :  { %p544_p9 = pnand %p542_p8, %p539_p7 }
 0x26c   :  { %547 = shalt.err (!%p544_p9)
}
 0x26d   :  { %318 = dma.vmem_to_hbm [thread:$0]  %s313_s8, 256, %s704_s2, [#allocation4], %s558_s0, %s558_s0, %s559_s5  }
 0x26e   :  { %552 = dma.done.wait [#allocation4], 256  }
 0x26f   :  { %553 = vsyncadd [#allocation4], 4294967040 }
 0x270   :  { %322 = vsyncpa [#allocation3], 1 }
 0x271   :  { %323 = vsyncpa [#allocation6], 1 }
 0x272   :  { %324 = vsyncpa [#allocation4], 1 }

</bundles_post_ra>
